<compile_context>
chip_gen: v5e
topology: v5e:2x2
jax: 0.10.0
libtpu: 0.0.40
codegen_flags: <defaults>
</compile_context>

<pallas_src>
import functools

import jax
import jax.numpy as jnp
from jax import lax
from jax.experimental import pallas as pl
from jax.experimental.pallas import tpu as pltpu


def _softmax_rows(x, approx_recip):
    """Numerically-stable softmax over the last (lane) axis."""
    m = jnp.max(x, axis=1, keepdims=True)
    e = jnp.exp(x - m)
    s = jnp.sum(e, axis=1, keepdims=True)
    return e * pl.reciprocal(s, approx=approx_recip)


def _efficient_attention_kernel(x_ref, wp_ref, bp_ref, wr_ref, br_ref,
                                seg_ref, mask_ref, o_ref, *,
                                head_count, key_channels, value_channels,
                                block_b, approx_recip):
    kc, vc = key_channels, value_channels

    # Loop-invariant loads: weights / biases / head-structure matrices are small
    # and stay resident in VMEM across the whole grid.
    wp = wp_ref[...]                       # (2*Kc+Vc, D)  native dtype -> MXU
    wr = wr_ref[...]                       # (D, Vc)       native dtype -> MXU
    bp = bp_ref[...]                       # (2*Kc+Vc, 1)  f32
    br = br_ref[...]                       # (D, 1)        f32
    seg = seg_ref[...]                     # (Kc, H)       f32 one-hot head map
    head_mask = mask_ref[...]              # (Vc, Kc)      f32 block-diagonal

    mm = (((1,), (0,)), ((), ()))          # (A, C) x (C, N) -> (A, N)
    mm_t = (((1,), (1,)), ((), ()))        # (A, N) x (B, N) -> (A, B)
    mm_seg = (((0,), (0,)), ((), ()))      # (Kc, H) x (Kc, N) -> (H, N)

    def body(b, carry):
        x = x_ref[b]                                              # (D, N)

        # Stacked projection: keys / queries / values in one MXU pass.
        proj = lax.dot_general(wp, x, mm,
                               preferred_element_type=jnp.float32) + bp
        keys = proj[:kc]                                          # (Kc, N)
        queries = proj[kc:2 * kc]                                 # (Kc, N)
        values = proj[2 * kc:]                                    # (Vc, N)

        # k: softmax over the spatial axis (row-wise, identical to per-head).
        k = _softmax_rows(keys, approx_recip)

        # q: per-head softmax over channels, computed full-width.  The shift is
        # the global per-column max (softmax is shift-invariant within each
        # head's normalisation group); head-wise denominators are recovered with
        # two tiny segment matmuls instead of per-head sublane slicing.
        mq = jnp.max(queries, axis=0, keepdims=True)              # (1, N)
        eq = jnp.exp(queries - mq)                                # (Kc, N)
        hsum = lax.dot_general(seg, eq, mm_seg,
                               preferred_element_type=jnp.float32)   # (H, N)
        denom = lax.dot_general(seg, hsum, mm,
                                preferred_element_type=jnp.float32)  # (Kc, N)
        q = eq * pl.reciprocal(denom, approx=approx_recip)

        # Full-width context (Vc, Kc); head structure applied as a block-diag
        # mask -> identical result to per-head (hk, N) x (hv, N) matmuls but
        # with a single, much better-filled MXU pass over N.
        ctx_t = lax.dot_general(values, k, mm_t,
                                preferred_element_type=jnp.float32)   # (Vc, Kc)
        if head_count > 1:
            ctx_t = ctx_t * head_mask
        att = lax.dot_general(ctx_t, q, mm,
                              preferred_element_type=jnp.float32)     # (Vc, N)

        out = lax.dot_general(wr, att.astype(wr.dtype), mm,
                              preferred_element_type=jnp.float32) + br
        o_ref[b] = out.astype(o_ref.dtype)
        return carry

    if block_b == 1:
        body(0, 0)
    else:
        # fori_loop (not an unrolled Python loop) bounds the live ranges of the
        # per-batch f32 intermediates to a single iteration.
        lax.fori_loop(0, block_b, body, 0)


def efficient_attention(x, wk, bk, wq, bq, wv, bv, wr, br, *, head_count=1,
                        block_b=None, approx_recip=False):
    """Pallas equivalent of EfficientAttention.forward.

    Args:
      x : (B, D, H, W)
      wk, wq : (key_channels, D)   bk, bq : (key_channels,)
      wv     : (value_channels, D) bv     : (value_channels,)
      wr     : (D, value_channels) br     : (D,)
    Returns:
      (B, D, H, W)
    """
    n, d, h, w = x.shape
    spatial = h * w
    kc = wk.shape[0]
    vc = wv.shape[0]
    assert kc % head_count == 0 and vc % head_count == 0
    hk = kc // head_count
    hv = vc // head_count
    p = 2 * kc + vc

    xf = x.reshape(n, d, spatial)
    # Stack the three projections (they share the same RHS) into one weight.
    wp = jnp.concatenate([wk, wq, wv], axis=0).astype(x.dtype)            # (P, D)
    bp = jnp.concatenate([bk, bq, bv], axis=0).astype(jnp.float32).reshape(p, 1)
    wr2 = wr.astype(x.dtype)                                              # (D, Vc)
    br2 = br.astype(jnp.float32).reshape(d, 1)

    # Head-structure matrices (tiny, VMEM-resident): one-hot channel->head map
    # and the block-diagonal value-row/key-row mask.
    head_of_k = jnp.arange(kc, dtype=jnp.int32) // hk
    head_of_v = jnp.arange(vc, dtype=jnp.int32) // hv
    seg = (head_of_k[:, None] ==
           jnp.arange(head_count, dtype=jnp.int32)[None, :]).astype(jnp.float32)
    head_mask = (head_of_v[:, None] == head_of_k[None, :]).astype(jnp.float32)

    itemsize = x.dtype.itemsize

    # ---- VMEM budgeting -----------------------------------------------------
    try:
        vmem_phys = int(pltpu.get_tpu_info().vmem_capacity_bytes)
    except Exception:
        vmem_phys = 64 * 1024 * 1024            # conservative: v7x per-core VMEM
    budget = int(0.65 * vmem_phys)              # headroom for compiler scratch

    # Resident weights/biases/masks (double-buffered by the pipeline).
    weight_bytes = 2 * (itemsize * (p * d + d * vc)
                        + 4 * (p + d + kc * head_count + vc * kc))
    # Per-batch f32 working set inside the fori_loop body (proj, softmax temps,
    # context/att, output plane).  Generous over-estimate.
    work_bytes = 4 * spatial * (2 * p + 3 * kc + 2 * vc + 2 * d)

    def footprint(bb):
        tile = bb * d * spatial * itemsize
        return 4 * tile + weight_bytes + work_bytes   # 2x dbl-buffered in + out

    if block_b is None:
        # Largest divisor of n under the VMEM budget; keep >= 2 grid steps when
        # n >= 2 so the "parallel" batch axis can shard across TensorCores
        # (v7x megacore); soft-cap at 8 batches per step.
        cap = max(1, min(8, n // 2)) if n >= 2 else 1
        block_b = 1
        for cand in range(cap, 0, -1):
            if n % cand == 0 and footprint(cand) <= budget:
                block_b = cand
                break
    assert n % block_b == 0, "block_b must divide the batch size"

    vmem_limit = int(min(vmem_phys,
                         max(int(1.5 * footprint(block_b)) + (8 << 20),
                             32 << 20)))

    grid = (n // block_b,)
    kernel = functools.partial(
        _efficient_attention_kernel,
        head_count=head_count, key_channels=kc, value_channels=vc,
        block_b=block_b, approx_recip=approx_recip)

    def full(shape):
        return pl.BlockSpec(shape, lambda i: (0,) * len(shape))

    grid_spec = pltpu.PrefetchScalarGridSpec(
        num_scalar_prefetch=0,
        grid=grid,
        in_specs=[
            pl.BlockSpec((block_b, d, spatial), lambda i: (i, 0, 0)),
            full((p, d)), full((p, 1)),
            full((d, vc)), full((d, 1)),
            full((kc, head_count)), full((vc, kc)),
        ],
        out_specs=pl.BlockSpec((block_b, d, spatial), lambda i: (i, 0, 0)),
    )

    out = pl.pallas_call(
        kernel,
        out_shape=jax.ShapeDtypeStruct((n, d, spatial), x.dtype),
        grid_spec=grid_spec,
        compiler_params=pltpu.CompilerParams(
            dimension_semantics=("parallel",),
            vmem_limit_bytes=vmem_limit),
    )(xf, wp, bp, wr2, br2, seg, head_mask)
    return out.reshape(n, d, h, w)


def _reference(x, wk, bk, wq, bq, wv, bv, wr, br, *, head_count):
    """Pure-JAX mirror of the PyTorch forward (1x1 conv == channel matmul)."""
    n, d, h, w = x.shape
    spatial = h * w
    xf = x.reshape(n, d, spatial)
    keys = jnp.einsum("kd,bdn->bkn", wk, xf) + bk[None, :, None]
    queries = jnp.einsum("kd,bdn->bkn", wq, xf) + bq[None, :, None]
    values = jnp.einsum("vd,bdn->bvn", wv, xf) + bv[None, :, None]
    kc = wk.shape[0]
    vc = wv.shape[0]
    hk = kc // head_count
    hv = vc // head_count
    outs = []
    for i in range(head_count):
        k = jax.nn.softmax(keys[:, i * hk:(i + 1) * hk, :], axis=2)
        q = jax.nn.softmax(queries[:, i * hk:(i + 1) * hk, :], axis=1)
        v = values[:, i * hv:(i + 1) * hv, :]
        context = jnp.einsum("bkn,bvn->bkv", k, v)
        att = jnp.einsum("bkv,bkn->bvn", context, q)
        outs.append(att)
    agg = jnp.concatenate(outs, axis=1)
    out = jnp.einsum("dv,bvn->bdn", wr, agg) + br[None, :, None]
    return out.reshape(n, d, h, w)


if __name__ == "__main__":
    # small shapes consistent with x:[B, D, H, W]; B=4 exercises both the
    # multi-step grid and the in-kernel fori_loop (block_b=2).
    B, D, H, W = 4, 4, 16, 16
    key_channels, value_channels, head_count = 8, 8, 2

    root = jax.random.PRNGKey(0)
    ks = jax.random.split(root, 9)
    x = jax.random.normal(ks[0], (B, D, H, W), dtype=jnp.float32)
    wk = jax.random.normal(ks[1], (key_channels, D), jnp.float32) * 0.2
    bk = jax.random.normal(ks[2], (key_channels,), jnp.float32) * 0.1
    wq = jax.random.normal(ks[3], (key_channels, D), jnp.float32) * 0.2
    bq = jax.random.normal(ks[4], (key_channels,), jnp.float32) * 0.1
    wv = jax.random.normal(ks[5], (value_channels, D), jnp.float32) * 0.2
    bv = jax.random.normal(ks[6], (value_channels,), jnp.float32) * 0.1
    wr = jax.random.normal(ks[7], (D, value_channels), jnp.float32) * 0.2
    br = jax.random.normal(ks[8], (D,), jnp.float32) * 0.1

    out = efficient_attention(x, wk, bk, wq, bq, wv, bv, wr, br,
                              head_count=head_count)
    jax.block_until_ready(out)

    ref = _reference(x, wk, bk, wq, bq, wv, bv, wr, br, head_count=head_count)
    assert out.shape == (B, D, H, W)
    assert jnp.allclose(out, ref, atol=1e-4, rtol=1e-4), "output mismatch"

    print("KERNEL_OK")
</pallas_src>

<mosaic_0001>
module attributes {stable_mosaic.version = 11 : i64} {
  func.func @_efficient_attention_kernel(%arg0: i32, %arg1: memref<2x4x256xf32, #tpu.memory_space<vmem>>, %arg2: memref<24x4xf32, #tpu.memory_space<vmem>>, %arg3: memref<24x1xf32, #tpu.memory_space<vmem>>, %arg4: memref<4x8xf32, #tpu.memory_space<vmem>>, %arg5: memref<4x1xf32, #tpu.memory_space<vmem>>, %arg6: memref<8x2xf32, #tpu.memory_space<vmem>>, %arg7: memref<8x8xf32, #tpu.memory_space<vmem>>, %arg8: memref<2x4x256xf32, #tpu.memory_space<vmem>>) attributes {dimension_semantics = [#tpu.dimension_semantics<parallel>], iteration_bounds = array<i64: 2>, scalar_prefetch = 0 : i64, scratch_operands = 0 : i64, tpu.core_type = #tpu.core_type<tc>, window_params = [{transform_indices = @transform_0, window_bounds = array<i64: 2, 4, 256>}, {pipeline_mode = #tpu.pipeline_mode<synchronous>, transform_indices = @transform_1, window_bounds = array<i64: 24, 4>}, {pipeline_mode = #tpu.pipeline_mode<synchronous>, transform_indices = @transform_2, window_bounds = array<i64: 24, 1>}, {pipeline_mode = #tpu.pipeline_mode<synchronous>, transform_indices = @transform_3, window_bounds = array<i64: 4, 8>}, {pipeline_mode = #tpu.pipeline_mode<synchronous>, transform_indices = @transform_4, window_bounds = array<i64: 4, 1>}, {pipeline_mode = #tpu.pipeline_mode<synchronous>, transform_indices = @transform_5, window_bounds = array<i64: 8, 2>}, {pipeline_mode = #tpu.pipeline_mode<synchronous>, transform_indices = @transform_6, window_bounds = array<i64: 8, 8>}, {transform_indices = @transform_7, window_bounds = array<i64: 2, 4, 256>}]} {
    %c0 = arith.constant 0 : index
    %c0_0 = arith.constant 0 : index
    %0 = vector.load %arg2[%c0, %c0_0] : memref<24x4xf32, #tpu.memory_space<vmem>>, vector<24x4xf32>
    %c0_1 = arith.constant 0 : index
    %c0_2 = arith.constant 0 : index
    %1 = vector.load %arg4[%c0_1, %c0_2] : memref<4x8xf32, #tpu.memory_space<vmem>>, vector<4x8xf32>
    %c0_3 = arith.constant 0 : index
    %c0_4 = arith.constant 0 : index
    %2 = vector.load %arg3[%c0_3, %c0_4] : memref<24x1xf32, #tpu.memory_space<vmem>>, vector<24x1xf32>
    %c0_5 = arith.constant 0 : index
    %c0_6 = arith.constant 0 : index
    %3 = vector.load %arg5[%c0_5, %c0_6] : memref<4x1xf32, #tpu.memory_space<vmem>>, vector<4x1xf32>
    %c0_7 = arith.constant 0 : index
    %c0_8 = arith.constant 0 : index
    %4 = vector.load %arg6[%c0_7, %c0_8] : memref<8x2xf32, #tpu.memory_space<vmem>>, vector<8x2xf32>
    %c0_9 = arith.constant 0 : index
    %c0_10 = arith.constant 0 : index
    %5 = vector.load %arg7[%c0_9, %c0_10] : memref<8x8xf32, #tpu.memory_space<vmem>>, vector<8x8xf32>
    %c0_i32 = arith.constant 0 : i32
    %c2_i32 = arith.constant 2 : i32
    %6 = arith.addi %c0_i32, %c2_i32 : i32
    %c1_i32 = arith.constant 1 : i32
    scf.for %arg9 = %c0_i32 to %6 step %c1_i32  : i32 {
      %7 = arith.index_cast %arg9 : i32 to index
      %c0_12 = arith.constant 0 : index
      %c0_13 = arith.constant 0 : index
      %8 = vector.load %arg1[%7, %c0_12, %c0_13] : memref<2x4x256xf32, #tpu.memory_space<vmem>>, vector<1x4x256xf32>
      %9 = vector.shape_cast %8 : vector<1x4x256xf32> to vector<4x256xf32>
      %cst = arith.constant dense<0.000000e+00> : vector<24x256xf32>
      %10 = tpu.matmul %0, %9, %cst {dimension_numbers = #tpu.dot_dimension_numbers<[1], [0], [0], [1], [0, 0, 1, 1], [], []>} : vector<24x4xf32>, vector<4x256xf32>, vector<24x256xf32> -> vector<24x256xf32>
      %11 = vector.broadcast %2 : vector<24x1xf32> to vector<24x256xf32>
      %12 = arith.addf %10, %11 : vector<24x256xf32>
      %13 = vector.extract_strided_slice %12 {offsets = [0, 0], sizes = [8, 256], strides = [1, 1]} : vector<24x256xf32> to vector<8x256xf32>
      %14 = vector.extract_strided_slice %12 {offsets = [8, 0], sizes = [8, 256], strides = [1, 1]} : vector<24x256xf32> to vector<8x256xf32>
      %15 = vector.extract_strided_slice %12 {offsets = [16, 0], sizes = [8, 256], strides = [1, 1]} : vector<24x256xf32> to vector<8x256xf32>
      %cst_14 = arith.constant dense<0xFF800000> : vector<8xf32>
      %16 = vector.multi_reduction <maximumf>, %13, %cst_14 [1] : vector<8x256xf32> to vector<8xf32>
      %17 = vector.shape_cast %16 : vector<8xf32> to vector<8x1xf32>
      %18 = vector.broadcast %17 : vector<8x1xf32> to vector<8x256xf32>
      %19 = arith.subf %13, %18 : vector<8x256xf32>
      %20 = math.exp %19 : vector<8x256xf32>
      %cst_15 = arith.constant dense<0.000000e+00> : vector<8xf32>
      %21 = vector.multi_reduction <add>, %20, %cst_15 [1] : vector<8x256xf32> to vector<8xf32>
      %22 = vector.shape_cast %21 : vector<8xf32> to vector<8x1xf32>
      %23 = tpu.reciprocal %22 : vector<8x1xf32> -> vector<8x1xf32>
      %24 = vector.broadcast %23 : vector<8x1xf32> to vector<8x256xf32>
      %25 = arith.mulf %20, %24 : vector<8x256xf32>
      %cst_16 = arith.constant dense<0xFF800000> : vector<256xf32>
      %26 = vector.multi_reduction <maximumf>, %14, %cst_16 [0] : vector<8x256xf32> to vector<256xf32>
      %27 = vector.shape_cast %26 : vector<256xf32> to vector<1x256xf32>
      %28 = vector.broadcast %27 : vector<1x256xf32> to vector<8x256xf32>
      %29 = arith.subf %14, %28 : vector<8x256xf32>
      %30 = math.exp %29 : vector<8x256xf32>
      %cst_17 = arith.constant dense<0.000000e+00> : vector<2x256xf32>
      %31 = tpu.matmul %4, %30, %cst_17 {dimension_numbers = #tpu.dot_dimension_numbers<[0], [0], [1], [1], [0, 1, 1, 1], [], []>} : vector<8x2xf32>, vector<8x256xf32>, vector<2x256xf32> -> vector<2x256xf32>
      %cst_18 = arith.constant dense<0.000000e+00> : vector<8x256xf32>
      %32 = tpu.matmul %4, %31, %cst_18 {dimension_numbers = #tpu.dot_dimension_numbers<[1], [0], [0], [1], [0, 0, 1, 1], [], []>} : vector<8x2xf32>, vector<2x256xf32>, vector<8x256xf32> -> vector<8x256xf32>
      %33 = tpu.reciprocal %32 : vector<8x256xf32> -> vector<8x256xf32>
      %34 = arith.mulf %30, %33 : vector<8x256xf32>
      %cst_19 = arith.constant dense<0.000000e+00> : vector<8x8xf32>
      %35 = tpu.matmul %15, %25, %cst_19 {dimension_numbers = #tpu.dot_dimension_numbers<[1], [1], [0], [0], [0, 0, 1, 0], [], []>} : vector<8x256xf32>, vector<8x256xf32>, vector<8x8xf32> -> vector<8x8xf32>
      %36 = arith.mulf %35, %5 : vector<8x8xf32>
      %cst_20 = arith.constant dense<0.000000e+00> : vector<8x256xf32>
      %37 = tpu.matmul %36, %34, %cst_20 {dimension_numbers = #tpu.dot_dimension_numbers<[1], [0], [0], [1], [0, 0, 1, 1], [], []>} : vector<8x8xf32>, vector<8x256xf32>, vector<8x256xf32> -> vector<8x256xf32>
      %cst_21 = arith.constant dense<0.000000e+00> : vector<4x256xf32>
      %38 = tpu.matmul %1, %37, %cst_21 {dimension_numbers = #tpu.dot_dimension_numbers<[1], [0], [0], [1], [0, 0, 1, 1], [], []>} : vector<4x8xf32>, vector<8x256xf32>, vector<4x256xf32> -> vector<4x256xf32>
      %39 = vector.broadcast %3 : vector<4x1xf32> to vector<4x256xf32>
      %40 = arith.addf %38, %39 : vector<4x256xf32>
      %41 = arith.index_cast %arg9 : i32 to index
      %c0_22 = arith.constant 0 : index
      %c0_23 = arith.constant 0 : index
      %42 = vector.load %arg8[%41, %c0_22, %c0_23] : memref<2x4x256xf32, #tpu.memory_space<vmem>>, vector<1x4x256xf32>
      %43 = vector.shape_cast %42 : vector<1x4x256xf32> to vector<4x256xf32>
      %44 = vector.shape_cast %40 : vector<4x256xf32> to vector<1x4x256xf32>
      tpu.vector_store %arg8[%41, %c0_22, %c0_23], %44 {strides = array<i32>} : memref<2x4x256xf32, #tpu.memory_space<vmem>>, vector<1x4x256xf32>,
    }
    %c2_i32_11 = arith.constant 2 : i32
    return
  }
  func.func @transform_0(%arg0: i32) -> (i32, i32, i32) {
    %c0_i32 = arith.constant 0 : i32
    %c0_i32_0 = arith.constant 0 : i32
    %c0_i32_1 = arith.constant 0 : i32
    return %arg0, %c0_i32, %c0_i32_0 : i32, i32, i32
  }
  func.func @transform_1(%arg0: i32) -> (i32, i32) {
    %c0_i32 = arith.constant 0 : i32
    %c0_i32_0 = arith.constant 0 : i32
    %c0_i32_1 = arith.constant 0 : i32
    return %c0_i32, %c0_i32_0 : i32, i32
  }
  func.func @transform_2(%arg0: i32) -> (i32, i32) {
    %c0_i32 = arith.constant 0 : i32
    %c0_i32_0 = arith.constant 0 : i32
    %c0_i32_1 = arith.constant 0 : i32
    return %c0_i32, %c0_i32_0 : i32, i32
  }
  func.func @transform_3(%arg0: i32) -> (i32, i32) {
    %c0_i32 = arith.constant 0 : i32
    %c0_i32_0 = arith.constant 0 : i32
    %c0_i32_1 = arith.constant 0 : i32
    return %c0_i32, %c0_i32_0 : i32, i32
  }
  func.func @transform_4(%arg0: i32) -> (i32, i32) {
    %c0_i32 = arith.constant 0 : i32
    %c0_i32_0 = arith.constant 0 : i32
    %c0_i32_1 = arith.constant 0 : i32
    return %c0_i32, %c0_i32_0 : i32, i32
  }
  func.func @transform_5(%arg0: i32) -> (i32, i32) {
    %c0_i32 = arith.constant 0 : i32
    %c0_i32_0 = arith.constant 0 : i32
    %c0_i32_1 = arith.constant 0 : i32
    return %c0_i32, %c0_i32_0 : i32, i32
  }
  func.func @transform_6(%arg0: i32) -> (i32, i32) {
    %c0_i32 = arith.constant 0 : i32
    %c0_i32_0 = arith.constant 0 : i32
    %c0_i32_1 = arith.constant 0 : i32
    return %c0_i32, %c0_i32_0 : i32, i32
  }
  func.func @transform_7(%arg0: i32) -> (i32, i32, i32) {
    %c0_i32 = arith.constant 0 : i32
    %c0_i32_0 = arith.constant 0 : i32
    %c0_i32_1 = arith.constant 0 : i32
    return %arg0, %c0_i32, %c0_i32_0 : i32, i32, i32
  }
}

</mosaic_0001>

<bundles_post_ra>
// kernel: tpu_custom_call.1
= control target key start
LH: loop header
LB: loop body
LE: loop exit
PB: predicated region body
PF: predicated region fallthrough
CT: control target
= control target key end

     0   :  { %12 = vsyncpa [#allocation3], 0  ;;  %s1237_s0 = inlined_call_operand.vmem [shape: f32[4,4,256], index: 0, kind: input, shape index: {}]   ;;  %s1238_s1 = inlined_call_operand.vmem [shape: f32[24,4], index: 1, kind: input, shape index: {}]   ;;  %s1239_s2 = inlined_call_operand.vmem [shape: f32[24,1], index: 2, kind: input, shape index: {}]   ;;  %s1240_s3 = inlined_call_operand.vmem [shape: f32[4,8], index: 3, kind: input, shape index: {}]   ;;  %s1241_s4 = inlined_call_operand.vmem [shape: f32[4,1], index: 4, kind: input, shape index: {}]   ;;  %s1242_s5 = inlined_call_operand.vmem [shape: f32[8,2], index: 5, kind: input, shape index: {}]   ;;  %s1243_s6 = inlined_call_operand.vmem [shape: f32[8,8], index: 6, kind: input, shape index: {}]   ;;  %s1244_s7 = inlined_call_operand.hbm [shape: f32[4,4,256], index: 7, kind: output, shape index: {}]  }
   0x1   :  { %14 = vsyncpa [#allocation3 + $0x1], 0  ;;  %s1043_s24 = smov 0   ;;  %s1045_s25 = smov 0  }
   0x2   :  { %s1047_s26 = smov 0   ;;  %s1049_s27 = smov 0  }
   0x3 LB: > { %s1064_s28 = sadd.s32 4294967295, %s994_s27   ;;  %s820_s29 = sadd.s32 4294967294, %s994_s27   ;;  %s994_s27 = sphi %s1049_s27, %s1250_s27   ;;  %s990_s26 = sphi %s1047_s26, %s1249_s26   ;;  %s986_s25 = sphi %s1045_s25, %s1248_s25   ;;  %s982_s24 = sphi %s1043_s24, %s1247_s24  }
   0x4   : > { %s1068_s30 = sadd.s32 1, %s994_s27   ;;  %s179_s8 = sadd.s32 1, %s990_s26 }
   0x5   : > { %s176_s9 = ssub.s32 %s994_s27, %s1068_s30  ;;  %p189_p0 = scmp.ne.s32.totalorder %s990_s26, %s986_s25 }
   0x6   : > { %p177_p1 = scmp.eq.s32.totalorder %s176_s9, 0  ;;  %p190_p2 = scmp.eq.s32.totalorder %s1064_s28, 1 }
   0x7   : > { %p195_p3 = scmp.ne.s32.totalorder %s986_s25, %s982_s24  ;;  %p196_p4 = scmp.eq.s32.totalorder %s820_s29, 1 }
   0x8   : > { %s1079_s10 = scalar_select %p177_p1, %s990_s26, %s179_s8  }
   0x9   : > { %p1081_p5 = por %p190_p2, %p189_p0  ;;  %p1085_p6 = por %p196_p4, %p195_p3 }
   0xa   : > { %p823_p7 = scmp.ge.s32.totalorder %s994_s27, 1  ;;  %p242_p8 = scmp.lt.s32.totalorder %s994_s27, 3 }
   0xc   : > { %p243_p9 = pnand %p823_p7, %p242_p8 }
   0xd   : > { %s272_s13 = sand.u32 (!%p243_p9), 1, %s986_s25   ;;  %s825_s14 = sshll.u32 (!%p243_p9), %s1064_s28, 1 }
   0xe   : > { %246 = sbr.rel (%p243_p9) target bundleno = 845 (0x34d), region = 48  ;;  %s1110_s21 = sshll.u32 (!%p243_p9), %s272_s13, 4 }
   0xf   : > { %p276_p10 = scmp.lt.s32.totalorder (!%p243_p9), %s825_s14, 3  ;;  %s274_s17 = scalar_lea.vmem (!%p243_p9), [#allocation2], %s1110_s21 }
  0x10   : > { %s1153_s18 = smov (!%p243_p9), 0  }
  0x13   : > { %v1096_v0 = vld [vmem:[%s1238_s1] sm:$0xff]  ;;  %v1101_v1 = vld [vmem:[%s1238_s1 + $0x8] sm:$0xff]  ;;  %v1106_v2 = vld [vmem:[%s1238_s1 + $0x10] sm:$0xff]  ;;  %s1252_s14 = smov (!%p276_p10, %s825_s14), 3 }
  0x14   : > { %v1115_v3 = vld [vmem:[%s1240_s3] sm:$0xf]  ;;  %v1125_v5 = vld [vmem:[%s1239_s2 + $0x8] sm:$0xff]  ;;  %v1130_v6 = vld [vmem:[%s1239_s2 + $0x10] sm:$0xff]  ;;  %s855_s8 = sshll.u32 %s1252_s14, 3 }
  0x15   : > { %v1120_v4 = vld [vmem:[%s1239_s2] sm:$0xff]  ;;  %s1150_s16 = scalar_lea.vmem %s1237_s0, %s855_s8 }
  0x16   : > { %v1135_v7 = vld [vmem:[%s1241_s4] sm:$0xf] }
  0x17   : > { %v1140_v8 = vld [vmem:[%s1242_s5] sm:$0xff] }
  0x18   : > { %v1145_v9 = vld [vmem:[%s1243_s6] sm:$0xff] }
  0x19 LB: >> { %v1000_v10 = vmov 0   ;;  %s856_s14 = sshll.u32 %s998_s18, 3  ;;  %vm332_vm0 = vcmask 1043456   ;;  %vm322_vm1 = vcmask 31744   ;;  %vm467_vm2 = vcmask 64512   ;;  %s298_s18 = sadd.s32 1, %s998_s18   ;;  %s998_s18 = sphi %s1153_s18, %s298_s18  }
  0x1a   : >> { %911 = vset.pattern.permute.xlu0 %v1000_v10  ;;  %912 = vset.pattern.permute.xlu1 %v1000_v10  ;;  %s301_s19 = scalar_lea.vmem %s1150_s16, %s856_s14  ;;  %vm515_vm3 = vcmask 1041408   ;;  %vm511_vm4 = vcmask 15360   ;;  %s730_s20 = scalar_lea.vmem %s274_s17, %s856_s14 [#allocation2] }
  0x1b   : >> { %310 = vperm.xlu0 %911, %v1125_v5   ;;  %305 = vperm.xlu1 %912, %v1120_v4   ;;  %v302_v11 = vld [vmem:[%s301_s19] sm:$0xff]  ;;  %p295_p11 = scmp.ge.s32.totalorder %s298_s18, 2  }
  0x1c   : >> { %913 = vset.pattern.permute.xlu2 %v1000_v10  ;;  %319 = vst [vmem:[#allocation1] ss:$2 sm:$0xff] %v302_v11  ;;  %s859_s22 = sshll.u32 (%p295_p11), %s1064_s28, 4  ;;  %s746_s9 = sshll.u32 (%p295_p11), %s274_s17, 4  ;;  %s747_s9 = int_to_ptr.vmem [resolvable:$true] %s746_s9 }
  0x1d   : > { %s745_s8 = scalar_lea.hbm (%p295_p11), %s1244_s7, %s859_s22  ;;  %s733_s14 = scalar_lea.sflag (%p295_p11), [#allocation3], %s272_s13 }
  0x1e   : > { %s748_s15 = sshll.u32 (%p295_p11), %s745_s8, 4  ;;  %s749_s15 = int_to_ptr.hbm [resolvable:$true] %s748_s15 }
  0x1f   : > { %s942_s19 = sshra.s32 (%p295_p11), %s749_s15, 4  ;;  %s943_s19 = int_to_ptr.hbm [resolvable:$true] %s942_s19 }
  0x20   : > { %s944_s18 = scalar_lea.hbm (%p295_p11), %s943_s19, 16  ;;  %p949_p1 = scmp.lt.s32.totalorder (%p295_p11), %s943_s19, %s1244_s7 }
  0x21   : > { %p945_p12 = scmp.ne.s32.totalorder (%p295_p11), %s943_s19, %s944_s18 }
  0x23   : >> { %v320_v12 = vld.sshfl [vmem:[#allocation1] sm:$0xff pattern:$0x75316420]  ;;  %v321_v13 = vld.sshfl [vmem:[#allocation1 + $0x8] sm:$0xff pattern:$0x75316420]  ;;  %p946_p13 = pnand (%p295_p11), %p945_p12, %p1081_p5 }
  0x24   : >> { %830 = vmatpush.msk.msra.mxu0 %vm332_vm0, %v320_v12  ;;  %834 = vmatpush.msk.msra.mxu1 %vm332_vm0, %v321_v13 }
  0x25   : >> { %831 = vmatmul.msk.f32.vlgmr.msra.gmra.mxu0 %vm322_vm1, %v1096_v0  ;;  %835 = vmatmul.msk.f32.vlgmr.msra.gmra.mxu1 %vm322_vm1, %v1096_v0  ;;  %p947_p0 = pneg (%p295_p11), %p946_p13 }
  0x2d   : >> { %832 = vmatmul.msk.f32.gmra.mxu0 %vm322_vm1, %v1101_v1  ;;  %836 = vmatmul.msk.f32.gmra.mxu1 %vm322_vm1, %v1101_v1 }
  0x35   : >> { %833 = vmatmul.msk.f32.gmra.mxu0 %vm322_vm1, %v1106_v2  ;;  %837 = vmatmul.msk.f32.gmra.mxu1 %vm322_vm1, %v1106_v2 }
  0x3d   : >> { %435 = vxpose.xlu0.b32.start.end [1/1] (short) (narrow) %v1140_v8, 8 }
  0x8d   : >> { %v306_v14 = vpop.permute.xlu1 %305  ;;  %v311_v20 = vpop.permute.xlu0 %310 }
  0xa2   : >> { %v354_v15 = vpop.f32.mrf.mxu0  ;;  %v380_v16 = vpop.f32.mrf.mxu1 }
  0xa3   : >> { %v355_v17 = vadd.f32 %v354_v15, %v306_v14  ;;  %v381_v18 = vadd.f32 %v380_v16, %v306_v14 }
  0xa5   : >> { %v389_v19 = vmax.f32 %v355_v17, %v381_v18 }
  0xa7   : >> { %390 = vmax.xlane.f32.xlu1 %v389_v19 }
  0xaa   : >> { %v357_v21 = vpop.f32.mrf.mxu0  ;;  %v383_v22 = vpop.f32.mrf.mxu1 }
  0xab   : >> { %v358_v23 = vadd.f32 %v357_v21, %v311_v20  ;;  %v384_v24 = vadd.f32 %v383_v22, %v311_v20 }
  0xad   : >> { %v417_v25 = vrot.slane %v358_v23, 4  ;;  %v423_v26 = vrot.slane %v384_v24, 4 }
  0xaf   : >> { %v418_v27 = vmax.f32 %v358_v23, %v417_v25  ;;  %v424_v28 = vmax.f32 %v384_v24, %v423_v26 }
  0xb1   : >> { %v419_v29 = vrot.slane %v418_v27, 2  ;;  %v425_v30 = vrot.slane %v424_v28, 2 }
  0xb2   : >> { %v360_v63 = vpop.f32.mrf.mxu0  ;;  %v386_v10 = vpop.f32.mrf.mxu1 }
  0xb3   : >> { %v420_v31 = vmax.f32 %v418_v27, %v419_v29  ;;  %v426_v32 = vmax.f32 %v424_v28, %v425_v30 }
  0xb5   : >> { %v421_v33 = vrot.slane %v420_v31, 1  ;;  %v427_v34 = vrot.slane %v426_v32, 1 }
  0xb7   : >> { %v422_v35 = vmax.f32 %v420_v31, %v421_v33  ;;  %v428_v36 = vmax.f32 %v426_v32, %v427_v34 }
  0xb9   : >> { %v429_v37 = vsub.f32 %v358_v23, %v422_v35  ;;  %v430_v38 = vsub.f32 %v384_v24, %v428_v36 }
  0xbb   : >> { %v431_v39 = vmul.f32 1.442695, %v429_v37  ;;  %v433_v40 = vmul.f32 1.442695, %v430_v38 }
  0xbd   : >> { %914 = vpow2.f32 %v431_v39 }
  0xbe   : >> { %916 = vpow2.f32 %v433_v40 }
  0xc3   : >> { %v1173_v41 = vpop.eup %914 }
  0xc4   : >> { %v1175_v42 = vpop.eup %916  ;;  %486 = vmatpush.msra.mxu2 %v1173_v41 }
  0xc5   : >> { %506 = vmatpush.msra.mxu3 %v1175_v42 }
  0xe1   : >> { %v451_v43 = vpop.trf.xlu0 }
  0xe2   : >> { %838 = vmatmul.msk.f32.vlgmr.msra.gmra.mxu2 %vm467_vm2, %v451_v43  ;;  %839 = vmatmul.msk.f32.vlgmr.msra.gmra.mxu3 %vm467_vm2, %v451_v43 }
 0x11a   : >> { %v391_v44 = vpop.xlane.xlu1 %390 }
 0x11b   : >> { %v392_v45 = vsub.f32 %v355_v17, %v391_v44  ;;  %v393_v46 = vsub.f32 %v381_v18, %v391_v44 }
 0x11d   : >> { %v394_v47 = vmul.f32 1.442695, %v392_v45  ;;  %v396_v48 = vmul.f32 1.442695, %v393_v46 }
 0x11f   : >> { %918 = vpow2.f32 %v394_v47 }
 0x120   : >> { %920 = vpow2.f32 %v396_v48 }
 0x125   : >> { %v919_v49 = vpop.eup %918 }
 0x126   : >> { %v921_v50 = vpop.eup %920 }
 0x127   : >> { %v398_v51 = vadd.f32 %v921_v50, %v919_v49 }
 0x129   : >> { %399 = vadd.xlane.f32.xlu2 %v398_v51 }
 0x141   : >> { %315 = vperm.xlu2 %913, %v1130_v6  }
 0x149   : >> { %678 = vperm.xlu2 %913, %v1135_v7  }
 0x165   : >> { %v488_v52 = vpop.f32.mrf.mxu2  ;;  %v508_v53 = vpop.f32.mrf.mxu3 }
 0x166   : >> { %840 = vmatpush.msk.msrb.mxu2 %vm515_vm3, %v488_v52  ;;  %842 = vmatpush.msk.msrb.mxu3 %vm515_vm3, %v508_v53 }
 0x167   : >> { %841 = vmatmul.msk.f32.vlgmr.msrb.gmra.mxu2 %vm511_vm4, %v1140_v8  ;;  %843 = vmatmul.msk.f32.vlgmr.msrb.gmra.mxu3 %vm511_vm4, %v1140_v8 }
 0x19c   : >> { %v400_v54 = vpop.xlane.xlu2 %399 }
 0x19d   : >> { %922 = vrcp.f32 %v400_v54  ;;  %v412_v58 = vand.u32 2147483648, %v400_v54  ;;  %v410_v60 = vand.u32 2147483647, %v400_v54  ;;  %vm406_vm6 = vweird.f32 %v400_v54 }
 0x19f   : >> { %v413_v62 = vor.u32 1.1754944e-38, %v412_v58  ;;  %vm411_vm8 = vcmp.eq.f32.partialorder %v410_v60, 8.507059e+37 }
 0x1a3   : >> { %v923_v55 = vpop.eup %922 }
 0x1a4   : >> { %v402_v56 = vmul.f32 %v923_v55, %v400_v54  ;;  %vm407_vm5 = vweird.f32 %v923_v55  ;;  %v316_v13 = vpop.permute.xlu2 %315 }
 0x1a5   : >> { %vm408_vm7 = vmor %vm406_vm6, %vm407_vm5  ;;  %v361_v16 = vadd.f32 %v360_v63, %v316_v13  ;;  %v387_v17 = vadd.f32 %v386_v10, %v316_v13 }
 0x1a6   : >> { %v403_v57 = vsub.f32 1.0, %v402_v56 }
 0x1a8   : >> { %v404_v59 = vmul.f32 %v923_v55, %v403_v57 }
 0x1aa   : >> { %v405_v61 = vadd.f32 %v923_v55, %v404_v59 }
 0x1ac   : >> { %v409_v11 = vsel %vm408_vm7, %v923_v55, %v405_v61 }
 0x1ad   : >> { %v414_v12 = vsel %vm411_vm8, %v413_v62, %v409_v11 }
 0x1ae   : >> { %v415_v14 = vmul.f32 %v919_v49, %v414_v12  ;;  %v416_v15 = vmul.f32 %v921_v50, %v414_v12 }
 0x1b0   : >> { %607 = vmatpush.xpose.msra.mxu2 %v415_v14  ;;  %627 = vmatpush.xpose.msra.mxu3 %v416_v15 }
 0x1b3   : >> { %608 = vmatmul.f32.vlgmr.msra.gmra.mxu2 %v361_v16  ;;  %628 = vmatmul.f32.vlgmr.msra.gmra.mxu3 %v387_v17 }
 0x1ea   : >> { %v539_v18 = vpop.f32.mrf.mxu2  ;;  %v559_v19 = vpop.f32.mrf.mxu3 }
 0x1eb   : >> { %924 = vrcp.f32 %v539_v18  ;;  %vm567_vm9 = vweird.f32 %v539_v18  ;;  %v573_v24 = vand.u32 2147483648, %v539_v18  ;;  %v571_v26 = vand.u32 2147483647, %v539_v18 }
 0x1ec   : >> { %926 = vrcp.f32 %v559_v19  ;;  %v587_v27 = vand.u32 2147483648, %v559_v19  ;;  %vm581_vm11 = vweird.f32 %v559_v19  ;;  %v585_v29 = vand.u32 2147483647, %v559_v19 }
 0x1ed   : >> { %v574_v32 = vor.u32 1.1754944e-38, %v573_v24  ;;  %vm572_vm14 = vcmp.eq.f32.partialorder %v571_v26, 8.507059e+37 }
 0x1ee   : >> { %v588_v34 = vor.u32 1.1754944e-38, %v587_v27  ;;  %vm586_vm1 = vcmp.eq.f32.partialorder %v585_v29, 8.507059e+37 }
 0x1f1   : >> { %v925_v20 = vpop.eup %924 }
 0x1f2   : >> { %v927_v21 = vpop.eup %926  ;;  %v563_v22 = vmul.f32 %v925_v20, %v539_v18  ;;  %vm568_vm10 = vweird.f32 %v925_v20 }
 0x1f3   : >> { %v577_v23 = vmul.f32 %v927_v21, %v559_v19  ;;  %vm582_vm12 = vweird.f32 %v927_v21  ;;  %vm569_vm13 = vmor %vm567_vm9, %vm568_vm10 }
 0x1f4   : >> { %v564_v25 = vsub.f32 1.0, %v563_v22  ;;  %vm583_vm15 = vmor %vm581_vm11, %vm582_vm12 }
 0x1f5   : >> { %v578_v28 = vsub.f32 1.0, %v577_v23 }
 0x1f6   : >> { %v565_v30 = vmul.f32 %v925_v20, %v564_v25 }
 0x1f7   : >> { %v579_v31 = vmul.f32 %v927_v21, %v578_v28 }
 0x1f8   : >> { %v566_v33 = vadd.f32 %v925_v20, %v565_v30 }
 0x1f9   : >> { %v580_v35 = vadd.f32 %v927_v21, %v579_v31 }
 0x1fa   : >> { %v570_v36 = vsel %vm569_vm13, %v925_v20, %v566_v33 }
 0x1fb   : >> { %v575_v37 = vsel %vm572_vm14, %v574_v32, %v570_v36  ;;  %v584_v38 = vsel %vm583_vm15, %v927_v21, %v580_v35 }
 0x1fc   : >> { %v590_v39 = vmul.f32 %v1173_v41, %v575_v37  ;;  %v589_v40 = vsel %vm586_vm1, %v588_v34, %v584_v38  ;;  %v679_v41 = vpop.permute.xlu2 %678 }
 0x1fd   : >> { %v591_v43 = vmul.f32 %v1175_v42, %v589_v40 }
 0x1fe   : >> { %651 = vmatpush.msrb.mxu0 %v590_v39 }
 0x1ff   : >> { %671 = vmatpush.msrb.mxu1 %v591_v43 }
 0x236   : >> { %v609_v44 = vpop.f32.mrf.mxu2  ;;  %v629_v45 = vpop.f32.mrf.mxu3 }
 0x237   : >> { %v630_v46 = vadd.f32 %v629_v45, %v609_v44 }
 0x239   : >> { %v632_v47 = vmul.f32 %v630_v46, %v1145_v9 }
 0x23b   : >> { %844 = vmatmul.msk.f32.vlgmr.msrb.gmra.mxu0 %vm467_vm2, %v632_v47  ;;  %845 = vmatmul.msk.f32.vlgmr.msrb.gmra.mxu1 %vm467_vm2, %v632_v47 }
 0x2b8   : >> { %v653_v48 = vpop.f32.mrf.mxu0  ;;  %v673_v49 = vpop.f32.mrf.mxu1 }
 0x2b9   : >> { %699 = vmatpush.msrb.mxu2 %v653_v48  ;;  %719 = vmatpush.msrb.mxu3 %v673_v49 }
 0x2ba   : >> { %846 = vmatmul.msk.f32.vlgmr.msrb.gmra.mxu2 %vm467_vm2, %v1115_v3  ;;  %847 = vmatmul.msk.f32.vlgmr.msrb.gmra.mxu3 %vm467_vm2, %v1115_v3 }
 0x33d   : >> { %v701_v42 = vpop.f32.mrf.mxu2  ;;  %v721_v50 = vpop.f32.mrf.mxu3 }
 0x33e   : >> { %v722_v51 = vadd.f32 %v721_v50, %v679_v41  ;;  %v702_v52 = vadd.f32 %v701_v42, %v679_v41 }
 0x33f   : > { %297 = sbr.rel (!%p295_p11) target bundleno = 25 (0x19), region = 92 }
 0x340   : >> { %v726_v53 = vrot.slane %v722_v51, 4 }
 0x342   : >> { %v727_v54 = vsel %vm332_vm0, %v702_v52, %v726_v53 }
 0x343   : >> { %731 = vst [vmem:[%s730_s20] sm:$0xff] %v727_v54  ;;  %s948_s20 = scalar_lea.hbm (%p295_p11), %s1244_s7, 32 }
 0x344   : > { %p950_p2 = scmp.lt.s32.totalorder %s948_s20, %s944_s18 }
 0x346   : > { %p951_p3 = por %p950_p2, %p949_p1 }
 0x348   : > { %p952_p4 = pnand %p951_p3, %p947_p0 }
 0x34a   : > { %955 = shalt.err (!%p952_p4)
}
 0x34b   : > { %s1001_s13 = smov 128   ;;  %s1002_s21 = smov 8  }
 0x34c   : > { %860 = dma.vmem_to_hbm [thread:$0]  (%p1081_p5), %s747_s9, 256, %s749_s15, %s733_s14, %s1001_s13, %s1001_s13, %s1002_s21  }
 0x34d PF: > { %p866_p7 = scmp.ge.s32.totalorder %s994_s27, 2  ;;  %s763_s17 = sand.u32 1, %s982_s24  }
 0x34e   : > { %s764_s29 = scalar_lea.sflag [#allocation3], %s763_s17 }
 0x34f   : > { %p863_p8 = pnand %p866_p7, %p1085_p6 }
 0x351   : > { %p864_p9 = pneg %p863_p8 }
 0x353   : > { %977 = dma.done.wait (%p864_p9), %s764_s29, 256  }
 0x354   : > { %979 = vsyncadd (%p864_p9), %s764_s29, 4294967040  ;;  %p17_p10 = scmp.ge.s32.totalorder %s1068_s30, 4   ;;  %s1247_s24 = smov %s986_s25 }
 0x355   : > { %s1248_s25 = smov %s990_s26  ;;  %s1249_s26 = smov %s1079_s10 }
 0x356   : > { %s1250_s27 = smov %s1068_s30  ;;  %19 = sbr.rel (!%p17_p10) target bundleno = 3 (0x3), region = 103 }
 0x35b   :  { %770 = vsyncpa [#allocation3], 1 }
 0x35c   :  { %772 = vsyncpa [#allocation3 + $0x1], 1 }

</bundles_post_ra>
